<compile_context>
chip_gen: v5e
topology: v5e:2x2
jax: 0.10.0
libtpu: 0.0.40
codegen_flags: <defaults>
</compile_context>

<pallas_src>
import functools

import jax
import jax.numpy as jnp
from jax.experimental import pallas as pl
from jax.experimental.pallas import tpu as pltpu

_LANE = 128
_H1, _H2 = 128, 64


def _cdiv(a, b):
    return -(-a // b)


def _round_up(a, m):
    return _cdiv(a, m) * m


def mlp_kernel(x_ref, w1_ref, b1_ref, w2_ref, b2_ref, w3_ref, b3_ref, o_ref):
    # Cast the x tile to bf16 in-VMEM (MXU-native; halves vreg pressure).
    x = x_ref[...].astype(jnp.bfloat16)

    # Layer 1: (TILE_B, F) @ (F, 128) on the MXU, f32 accumulate; bias+ReLU f32.
    h1 = jnp.dot(x, w1_ref[...], preferred_element_type=jnp.float32)
    h1 = jnp.maximum(h1 + b1_ref[...], 0.0).astype(jnp.bfloat16)

    # Layer 2: (TILE_B, 128) @ (128, 64)
    h2 = jnp.dot(h1, w2_ref[...], preferred_element_type=jnp.float32)
    h2 = jnp.maximum(h2 + b2_ref[...], 0.0).astype(jnp.bfloat16)

    # Layer 3: NT matmul — contract the 64-dim of w3 (1,64) with the 64-dim of
    # h2 (TILE_B,64), giving a lane-dense (1, TILE_B) tile (batch on lanes).
    # Same dimension-number pattern as flash-attention QK^T (no materialized
    # transpose of the big h2 tile).
    logits = jax.lax.dot_general(
        w3_ref[...], h2,
        dimension_numbers=(((1,), (1,)), ((), ())),
        preferred_element_type=jnp.float32,
    )                                       # (1, TILE_B)
    logits = logits + b3_ref[0, 0]          # scalar bias from SMEM
    o_ref[...] = jax.nn.sigmoid(logits).astype(o_ref.dtype)


def _pick_batch_tiling(B, F):
    """Pick (TILE_B, num_tiles) from a VMEM budget sized for the tightest
    generation (v7x: 64 MiB physical, ~48 MiB usable scoped)."""
    budget = 32 * 1024 * 1024
    # Resident weights (bf16); conservatively assume double-buffered blocks.
    weight_bytes = 2 * 2 * (F * _H1 + _H1 * _H2 + _H2 + _H1 + _H2)
    # Per-row: double-buffered f32 x tile + f32/bf16 h1/h2 intermediates + out.
    per_row = 2 * 4 * F + (_H1 * 4 + _H1 * 2 + _H2 * 4 + _H2 * 2) + 16
    tile_max = (budget - weight_bytes) // per_row
    tile_max = max(_LANE, min(int(tile_max), 8192))
    tile_max = (tile_max // _LANE) * _LANE

    if B <= tile_max and B < 1024:
        # Small batch: one full-extent block (no alignment constraints needed).
        return B, 1

    num_tiles = max(2, _cdiv(B, tile_max))
    if num_tiles % 2:
        num_tiles += 1          # even tile count splits evenly across 2 TCs (v7x)
    tile_b = _round_up(_cdiv(B, num_tiles), _LANE)   # balanced tiles
    return tile_b, _cdiv(B, tile_b)


def prepare_params(params):
    """Hoist per-call casts/reshapes: call once when params are created/updated.
    Weights -> bf16 (MXU operands), biases -> f32, b3 -> (1,1) SMEM scalar."""
    return {
        "w1": params["w1"].astype(jnp.bfloat16),                   # (F, 128)
        "b1": params["b1"].reshape(1, -1).astype(jnp.float32),     # (1, 128)
        "w2": params["w2"].astype(jnp.bfloat16),                   # (128, 64)
        "b2": params["b2"].reshape(1, -1).astype(jnp.float32),     # (1, 64)
        "w3": params["w3"].reshape(1, -1).astype(jnp.bfloat16),    # (1, 64)
        "b3": params["b3"].reshape(1, 1).astype(jnp.float32),      # (1, 1)
    }


@functools.partial(jax.jit)
def classification_nn_forward(x, prepared):
    """x: (B, F) float32 (or bfloat16). prepared: output of prepare_params.
    Returns (B, 1) float32 sigmoid probabilities."""
    w1, b1, w2, b2, w3, b3 = (prepared[k] for k in ("w1", "b1", "w2", "b2", "w3", "b3"))
    B, F = x.shape
    TILE_B, num_tiles = _pick_batch_tiling(B, F)

    flops = 2 * num_tiles * TILE_B * (F * _H1 + _H1 * _H2 + _H2)
    bytes_accessed = (x.size * x.dtype.itemsize
                      + (w1.size + w2.size + w3.size) * 2
                      + (b1.size + b2.size + b3.size) * 4
                      + B * 4)

    out = pl.pallas_call(
        mlp_kernel,
        out_shape=jax.ShapeDtypeStruct((1, B), jnp.float32),
        grid=(num_tiles,),
        in_specs=[
            pl.BlockSpec((TILE_B, F), lambda i: (i, 0)),        # x tile (pipelined)
            pl.BlockSpec((F, _H1), lambda i: (0, 0)),           # w1 (VMEM-resident)
            pl.BlockSpec((1, _H1), lambda i: (0, 0)),           # b1
            pl.BlockSpec((_H1, _H2), lambda i: (0, 0)),         # w2
            pl.BlockSpec((1, _H2), lambda i: (0, 0)),           # b2
            pl.BlockSpec((1, _H2), lambda i: (0, 0)),           # w3 (row form)
            pl.BlockSpec(memory_space=pltpu.MemorySpace.SMEM),  # b3 scalar
        ],
        out_specs=pl.BlockSpec((1, TILE_B), lambda i: (0, i)),  # lane-dense output
        compiler_params=pltpu.CompilerParams(
            dimension_semantics=("parallel",),
            vmem_limit_bytes=48 * 1024 * 1024),
        cost_estimate=pl.CostEstimate(
            flops=flops,
            transcendentals=num_tiles * TILE_B,
            bytes_accessed=bytes_accessed),
    )(x, w1, b1, w2, b2, w3, b3)

    return out.reshape(B, 1)


def init_params(key, input_size):
    """Mirror PyTorch nn.Linear default init: U(-1/sqrt(fan_in), 1/sqrt(fan_in)).
    Weights stored as (in_features, out_features) so the kernel computes x @ W + b."""
    dims = [(input_size, _H1), (_H1, _H2), (_H2, 1)]
    params = {}
    for i, (fan_in, fan_out) in enumerate(dims, start=1):
        key, kw, kb = jax.random.split(key, 3)
        bound = 1.0 / jnp.sqrt(float(fan_in))
        params[f"w{i}"] = jax.random.uniform(
            kw, (fan_in, fan_out), jnp.float32, minval=-bound, maxval=bound)
        params[f"b{i}"] = jax.random.uniform(
            kb, (1, fan_out), jnp.float32, minval=-bound, maxval=bound)
    return params


def _reference(x, params):
    h1 = jnp.maximum(x @ params["w1"] + params["b1"], 0.0)
    h2 = jnp.maximum(h1 @ params["w2"] + params["b2"], 0.0)
    return jax.nn.sigmoid(h2 @ params["w3"] + params["b3"])


if __name__ == "__main__":
    key = jax.random.PRNGKey(0)
    B, F = 10, 32  # small batch (single-block path), input_size = 32

    key, kx, kx2 = jax.random.split(key, 3)
    x = jax.random.normal(kx, (B, F), dtype=jnp.float32)
    params = init_params(key, F)
    prepared = prepare_params(params)

    out = classification_nn_forward(x, prepared)
    jax.block_until_ready(out)

    ref = _reference(x, params)
    assert out.shape == (B, 1)
    # bf16 matmul operands -> small tolerance vs the f32 reference
    assert jnp.allclose(out, ref, atol=2e-2), (
        f"mismatch vs reference: max abs diff {float(jnp.max(jnp.abs(out - ref)))}")

    # Also exercise the multi-tile path with a ragged tail (partial last block).
    B2 = 1500
    x2 = jax.random.normal(kx2, (B2, F), dtype=jnp.float32)
    out2 = classification_nn_forward(x2, prepared)
    jax.block_until_ready(out2)
    ref2 = _reference(x2, params)
    assert out2.shape == (B2, 1)
    assert jnp.allclose(out2, ref2, atol=2e-2), (
        f"ragged-tail mismatch: max abs diff {float(jnp.max(jnp.abs(out2 - ref2)))}")

    print("KERNEL_OK")
</pallas_src>

<mosaic_0001>
module attributes {stable_mosaic.version = 11 : i64} {
  func.func @mlp_kernel(%arg0: i32, %arg1: memref<10x32xf32, #tpu.memory_space<vmem>>, %arg2: memref<32x128xbf16, #tpu.memory_space<vmem>>, %arg3: memref<1x128xf32, #tpu.memory_space<vmem>>, %arg4: memref<128x64xbf16, #tpu.memory_space<vmem>>, %arg5: memref<1x64xf32, #tpu.memory_space<vmem>>, %arg6: memref<1x64xbf16, #tpu.memory_space<vmem>>, %arg7: memref<1x1xf32, #tpu.memory_space<smem>>, %arg8: memref<1x10xf32, #tpu.memory_space<vmem>>) attributes {dimension_semantics = [#tpu.dimension_semantics<parallel>], iteration_bounds = array<i64: 1>, scalar_prefetch = 0 : i64, scratch_operands = 0 : i64, tpu.core_type = #tpu.core_type<tc>, window_params = [{transform_indices = @transform_0, window_bounds = array<i64: 10, 32>}, {pipeline_mode = #tpu.pipeline_mode<synchronous>, transform_indices = @transform_1, window_bounds = array<i64: 32, 128>}, {pipeline_mode = #tpu.pipeline_mode<synchronous>, transform_indices = @transform_2, window_bounds = array<i64: 1, 128>}, {pipeline_mode = #tpu.pipeline_mode<synchronous>, transform_indices = @transform_3, window_bounds = array<i64: 128, 64>}, {pipeline_mode = #tpu.pipeline_mode<synchronous>, transform_indices = @transform_4, window_bounds = array<i64: 1, 64>}, {pipeline_mode = #tpu.pipeline_mode<synchronous>, transform_indices = @transform_5, window_bounds = array<i64: 1, 64>}, {transform_indices = @transform_6, window_bounds = array<i64: 1, 1>}, {transform_indices = @transform_7, window_bounds = array<i64: 1, 10>}]} {
    %c0 = arith.constant 0 : index
    %c0_0 = arith.constant 0 : index
    %0 = vector.load %arg1[%c0, %c0_0] : memref<10x32xf32, #tpu.memory_space<vmem>>, vector<10x32xf32>
    %1 = arith.truncf %0 : vector<10x32xf32> to vector<10x32xbf16>
    %c0_1 = arith.constant 0 : index
    %c0_2 = arith.constant 0 : index
    %2 = vector.load %arg2[%c0_1, %c0_2] : memref<32x128xbf16, #tpu.memory_space<vmem>>, vector<32x128xbf16>
    %cst = arith.constant dense<0.000000e+00> : vector<10x128xf32>
    %3 = tpu.matmul %1, %2, %cst {dimension_numbers = #tpu.dot_dimension_numbers<[1], [0], [0], [1], [0, 0, 1, 1], [], []>} : vector<10x32xbf16>, vector<32x128xbf16>, vector<10x128xf32> -> vector<10x128xf32>
    %c0_3 = arith.constant 0 : index
    %c0_4 = arith.constant 0 : index
    %4 = vector.load %arg3[%c0_3, %c0_4] : memref<1x128xf32, #tpu.memory_space<vmem>>, vector<1x128xf32>
    %5 = vector.broadcast %4 : vector<1x128xf32> to vector<10x128xf32>
    %6 = arith.addf %3, %5 : vector<10x128xf32>
    %cst_5 = arith.constant 0.000000e+00 : f32
    %7 = vector.broadcast %cst_5 : f32 to vector<10x128xf32>
    %8 = arith.maximumf %6, %7 : vector<10x128xf32>
    %9 = arith.truncf %8 : vector<10x128xf32> to vector<10x128xbf16>
    %c0_6 = arith.constant 0 : index
    %c0_7 = arith.constant 0 : index
    %10 = vector.load %arg4[%c0_6, %c0_7] : memref<128x64xbf16, #tpu.memory_space<vmem>>, vector<128x64xbf16>
    %cst_8 = arith.constant dense<0.000000e+00> : vector<10x64xf32>
    %11 = tpu.matmul %9, %10, %cst_8 {dimension_numbers = #tpu.dot_dimension_numbers<[1], [0], [0], [1], [0, 0, 1, 1], [], []>} : vector<10x128xbf16>, vector<128x64xbf16>, vector<10x64xf32> -> vector<10x64xf32>
    %c0_9 = arith.constant 0 : index
    %c0_10 = arith.constant 0 : index
    %12 = vector.load %arg5[%c0_9, %c0_10] : memref<1x64xf32, #tpu.memory_space<vmem>>, vector<1x64xf32>
    %13 = vector.broadcast %12 : vector<1x64xf32> to vector<10x64xf32>
    %14 = arith.addf %11, %13 : vector<10x64xf32>
    %cst_11 = arith.constant 0.000000e+00 : f32
    %15 = vector.broadcast %cst_11 : f32 to vector<10x64xf32>
    %16 = arith.maximumf %14, %15 : vector<10x64xf32>
    %17 = arith.truncf %16 : vector<10x64xf32> to vector<10x64xbf16>
    %c0_12 = arith.constant 0 : index
    %c0_13 = arith.constant 0 : index
    %18 = vector.load %arg6[%c0_12, %c0_13] : memref<1x64xbf16, #tpu.memory_space<vmem>>, vector<1x64xbf16>
    %cst_14 = arith.constant dense<0.000000e+00> : vector<1x10xf32>
    %19 = tpu.matmul %18, %17, %cst_14 {dimension_numbers = #tpu.dot_dimension_numbers<[1], [1], [0], [0], [0, 0, 1, 0], [], []>} : vector<1x64xbf16>, vector<10x64xbf16>, vector<1x10xf32> -> vector<1x10xf32>
    %c0_15 = arith.constant 0 : index
    %c0_16 = arith.constant 0 : index
    %20 = memref.load %arg7[%c0_15, %c0_16] : memref<1x1xf32, #tpu.memory_space<smem>>
    %21 = vector.broadcast %20 : f32 to vector<1x10xf32>
    %22 = arith.addf %19, %21 : vector<1x10xf32>
    %23 = arith.negf %22 : vector<1x10xf32>
    %24 = math.exp %23 : vector<1x10xf32>
    %cst_17 = arith.constant 1.000000e+00 : f32
    %25 = vector.broadcast %cst_17 : f32 to vector<1x10xf32>
    %26 = arith.addf %25, %24 : vector<1x10xf32>
    %27 = arith.divf %25, %26 : vector<1x10xf32>
    %c0_18 = arith.constant 0 : index
    %c0_19 = arith.constant 0 : index
    %28 = vector.load %arg8[%c0_18, %c0_19] : memref<1x10xf32, #tpu.memory_space<vmem>>, vector<1x10xf32>
    tpu.vector_store %arg8[%c0_18, %c0_19], %27 {strides = array<i32>} : memref<1x10xf32, #tpu.memory_space<vmem>>, vector<1x10xf32>,
    return
  }
  func.func @transform_0(%arg0: i32) -> (i32, i32) {
    %c0_i32 = arith.constant 0 : i32
    %c0_i32_0 = arith.constant 0 : i32
    return %arg0, %c0_i32 : i32, i32
  }
  func.func @transform_1(%arg0: i32) -> (i32, i32) {
    %c0_i32 = arith.constant 0 : i32
    %c0_i32_0 = arith.constant 0 : i32
    %c0_i32_1 = arith.constant 0 : i32
    return %c0_i32, %c0_i32_0 : i32, i32
  }
  func.func @transform_2(%arg0: i32) -> (i32, i32) {
    %c0_i32 = arith.constant 0 : i32
    %c0_i32_0 = arith.constant 0 : i32
    %c0_i32_1 = arith.constant 0 : i32
    return %c0_i32, %c0_i32_0 : i32, i32
  }
  func.func @transform_3(%arg0: i32) -> (i32, i32) {
    %c0_i32 = arith.constant 0 : i32
    %c0_i32_0 = arith.constant 0 : i32
    %c0_i32_1 = arith.constant 0 : i32
    return %c0_i32, %c0_i32_0 : i32, i32
  }
  func.func @transform_4(%arg0: i32) -> (i32, i32) {
    %c0_i32 = arith.constant 0 : i32
    %c0_i32_0 = arith.constant 0 : i32
    %c0_i32_1 = arith.constant 0 : i32
    return %c0_i32, %c0_i32_0 : i32, i32
  }
  func.func @transform_5(%arg0: i32) -> (i32, i32) {
    %c0_i32 = arith.constant 0 : i32
    %c0_i32_0 = arith.constant 0 : i32
    %c0_i32_1 = arith.constant 0 : i32
    return %c0_i32, %c0_i32_0 : i32, i32
  }
  func.func @transform_6(%arg0: i32) -> (i32, i32) {
    %c0_i32 = arith.constant 0 : i32
    %c0_i32_0 = arith.constant 0 : i32
    %c0_i32_1 = arith.constant 0 : i32
    return %c0_i32, %c0_i32_0 : i32, i32
  }
  func.func @transform_7(%arg0: i32) -> (i32, i32) {
    %c0_i32 = arith.constant 0 : i32
    %c0_i32_0 = arith.constant 0 : i32
    return %c0_i32, %arg0 : i32, i32
  }
}

</mosaic_0001>

<bundles_post_ra>
// kernel: classification_nn_forward.1
= control target key start
LH: loop header
LB: loop body
LE: loop exit
PB: predicated region body
PF: predicated region fallthrough
CT: control target
= control target key end

     0   :  { %s396_s0 = inlined_call_operand.vmem [shape: f32[10,32], index: 0, kind: input, shape index: {}]   ;;  %s397_s1 = inlined_call_operand.vmem [shape: bf16[32,128], index: 1, kind: input, shape index: {}]   ;;  %s398_s2 = inlined_call_operand.vmem [shape: f32[1,128], index: 2, kind: input, shape index: {}]   ;;  %s399_s3 = inlined_call_operand.vmem [shape: bf16[128,64], index: 3, kind: input, shape index: {}]   ;;  %s400_s4 = inlined_call_operand.vmem [shape: f32[1,64], index: 4, kind: input, shape index: {}]   ;;  %s401_s5 = inlined_call_operand.vmem [shape: bf16[1,64], index: 5, kind: input, shape index: {}]   ;;  %s402_s6 = inlined_call_operand.<no memory space> [shape: f32[1,1], index: 6, kind: input, shape index: {}]   ;;  %s403_s7 = inlined_call_operand.hbm [shape: f32[1,10], index: 7, kind: output, shape index: {}]  }
   0x1   :  { %v262_v0 = vld [vmem:[%s397_s1 + $0x8] sm:$0xff]  ;;  %v261_v1 = vld [vmem:[%s397_s1] sm:$0xff]  ;;  %v270_v2 = vld [vmem:[%s399_s3 + $0x38] sm:$0xff] }
   0x2   :  { %62 = vmatpush.bf16.msra.mxu0 %v262_v0  ;;  %v29_v3 = vld [vmem:[%s396_s0] sm:$0xff]  ;;  %v30_v4 = vld [vmem:[%s396_s0 + $0x8] sm:$0x3]  ;;  %141 = vmatpush.bf16.msra.mxu1 %v270_v2  ;;  %v269_v5 = vld [vmem:[%s399_s3 + $0x30] sm:$0xff] }
   0x3   :  { %13 = vsyncpa [#allocation4], 0  ;;  %v31_v6 = vpack.c.bf16 %v30_v4, %v29_v3  ;;  %vm52_vm0 = vcmask 261120   ;;  %v268_v7 = vld [vmem:[%s399_s3 + $0x28] sm:$0xff]  ;;  %v267_v8 = vld [vmem:[%s399_s3 + $0x20] sm:$0xff]  ;;  %vm161_vm1 = vcmask 523264   ;;  %v160_v31 = vstv %s402_s6 }
   0x4   :  { %v266_v9 = vld [vmem:[%s399_s3 + $0x18] sm:$0xff]  ;;  %v265_v10 = vld [vmem:[%s399_s3 + $0x10] sm:$0xff]  ;;  %v264_v11 = vld [vmem:[%s399_s3 + $0x8] sm:$0xff]  ;;  %s209_s6 = sshll.u32 %s403_s7, 4  ;;  %vm200_vm5 = vcmask 73728   ;;  %s210_s6 = int_to_ptr.hbm [resolvable:$true] %s209_s6 }
   0x5   :  { %v263_v12 = vld [vmem:[%s399_s3] sm:$0xff] }
   0x6   :  { %63 = vmatpush.bf16.msra.mxu0 %v261_v1  ;;  %142 = vmatpush.bf16.msra.mxu1 %v269_v5  ;;  %v272_v14 = vld [vmem:[%s398_s2] ss:$0 sm:$0xff] }
   0x7   :  { %v273_v22 = vld [vmem:[%s400_s4] ss:$0 sm:$0xff]  ;;  %s304_s4 = smov [#allocation3]  }
   0x8   :  { %v158_v30 = vld [vmem:[%s401_s5] sm:$0x1]  ;;  %s207_s5 = sshll.u32 %s304_s4, 4  ;;  %s208_s5 = int_to_ptr.vmem [resolvable:$true] %s207_s5 }
   0x9   :  { %226 = vmatmul.msk.bf16.vlgmr.msra.gmra.mxu0 %vm52_vm0, %v31_v6 }
   0xa   :  { %143 = vmatpush.bf16.msra.mxu1 %v268_v7 }
   0xe   :  { %144 = vmatpush.bf16.msra.mxu1 %v267_v8 }
  0x12   :  { %145 = vmatpush.bf16.msra.mxu1 %v266_v9 }
  0x16   :  { %146 = vmatpush.bf16.msra.mxu1 %v265_v10 }
  0x1a   :  { %147 = vmatpush.bf16.msra.mxu1 %v264_v11 }
  0x1e   :  { %148 = vmatpush.bf16.msra.mxu1 %v263_v12 }
  0x86   :  { %v65_v13 = vpop.f32.mrf.mxu0 }
  0x87   :  { %v66_v15 = vadd.f32 %v272_v14, %v65_v13 }
  0x89   :  { %v70_v18 = vmax.f32 %v66_v15, 0.0 }
  0x8e   :  { %v67_v16 = vpop.f32.mrf.mxu0 }
  0x8f   :  { %v68_v17 = vadd.f32 %v272_v14, %v67_v16 }
  0x91   :  { %v71_v19 = vmax.f32 %v68_v17, 0.0 }
  0x93   :  { %v72_v20 = vpack.c.bf16 %v71_v19, %v70_v18 }
  0x95   :  { %149 = vmatmul.bf16.vlgmr.msra.gmra.mxu1 %v72_v20 }
 0x112   :  { %v150_v21 = vpop.f32.mrf.mxu1 }
 0x113   :  { %v151_v23 = vadd.f32 %v273_v22, %v150_v21 }
 0x115   :  { %v155_v26 = vmax.f32 %v151_v23, 0.0 }
 0x11a   :  { %v152_v24 = vpop.f32.mrf.mxu1 }
 0x11b   :  { %v153_v25 = vadd.f32 %v273_v22, %v152_v24 }
 0x11d   :  { %v156_v27 = vmax.f32 %v153_v25, 0.0 }
 0x11f   :  { %v157_v28 = vpack.c.bf16 %v156_v27, %v155_v26 }
 0x121   :  { %v166_v29 = vsel %vm161_vm1, %v157_v28, 0 }
 0x122   :  { %175 = vmatpush.bf16.xpose.msra.mxu2 %v166_v29 }
 0x129   :  { %259 = vmatmul.msk.bf16.vlgmr.msra.gmra.mxu2 %vm161_vm1, %v158_v30 }
 0x1ac   :  { %v177_v32 = vpop.f32.mrf.mxu2 }
 0x1ad   :  { %v178_v33 = vadd.f32 %v177_v32, %v160_v31 }
 0x1af   :  { %v260_v34 = vmul.f32 -1.442695, %v178_v33 }
 0x1b1   :  { %274 = vpow2.f32 %v260_v34 }
 0x1b4   :  { %v179_v35 = vpop.f32.mrf.mxu2 }
 0x1b7   :  { %v275_v36 = vpop.eup %274 }
 0x1b8   :  { %v184_v37 = vadd.f32 1.0, %v275_v36 }
 0x1ba   :  { %276 = vrcp.f32 %v184_v37  ;;  %v196_v41 = vand.u32 2147483648, %v184_v37  ;;  %v194_v43 = vand.u32 2147483647, %v184_v37  ;;  %vm190_vm3 = vweird.f32 %v184_v37 }
 0x1bc   :  { %v197_v45 = vor.u32 1.1754944e-38, %v196_v41  ;;  %vm195_vm6 = vcmp.eq.f32.partialorder %v194_v43, 8.507059e+37 }
 0x1c0   :  { %v277_v38 = vpop.eup %276 }
 0x1c1   :  { %v186_v39 = vmul.f32 %v277_v38, %v184_v37  ;;  %vm191_vm2 = vweird.f32 %v277_v38 }
 0x1c2   :  { %vm192_vm4 = vmor %vm190_vm3, %vm191_vm2 }
 0x1c3   :  { %v187_v40 = vsub.f32 1.0, %v186_v39 }
 0x1c5   :  { %v188_v42 = vmul.f32 %v277_v38, %v187_v40 }
 0x1c7   :  { %v189_v44 = vadd.f32 %v277_v38, %v188_v42 }
 0x1c9   :  { %v193_v46 = vsel %vm192_vm4, %v277_v38, %v189_v44 }
 0x1ca   :  { %v198_v47 = vsel %vm195_vm6, %v197_v45, %v193_v46 }
 0x1cb   :  { %201 = vst.msk [vmem:[#allocation3] sm:$0x1] %vm200_vm5, %v198_v47 }
 0x1cc   :  { %212 = dma.vmem_to_hbm [thread:$0]  %s208_s5, 16, %s210_s6, [#allocation4]  }
 0x1cd   :  { %302 = dma.done.wait [#allocation4], 16  }
 0x1ce   :  { %303 = vsyncadd [#allocation4], 4294967280 }
 0x1cf   :  { %217 = vsyncpa [#allocation4], 1 }

</bundles_post_ra>
